<compile_context>
chip_gen: v7x
topology: tpu7x:2x2x1
jax: 0.10.0
libtpu: 0.0.40
codegen_flags: <defaults>
</compile_context>

<pallas_src>
import functools

import jax
import jax.numpy as jnp
from jax.experimental import pallas as pl
from jax.experimental.pallas import tpu as pltpu


def _make_kernel(deterministic: bool, input_dim: int, fc_dim: int, a_dim: int,
                 out_lanes: int):
    """Build the fused MLP -> softmax -> (sample | argmax) -> logprob kernel."""

    def body(x_ref, w_ref, out_ref, gumbel):
        f32 = jnp.float32
        x = x_ref[...]
        B = x.shape[0]

        def layer(h, idx, d_in, d_out):
            wb = w_ref[idx]                                  # (R, C) f32 slab
            w = wb[:d_in, :d_out].astype(jnp.bfloat16)       # weights -> bf16 MXU
            b = wb[d_in:d_in + 1, :d_out]                    # folded bias row, f32
            return jnp.dot(h.astype(jnp.bfloat16), w,
                           preferred_element_type=f32) + b

        # --- MLP: Linear -> ReLU -> Linear -> ReLU -> Linear ---------------
        h1 = jnp.maximum(layer(x, 0, input_dim, fc_dim), 0.0)
        h2 = jnp.maximum(layer(h1, 1, fc_dim, fc_dim), 0.0)
        logits = layer(h2, 2, fc_dim, a_dim)

        # --- softmax(logits) + 1e-7  (matches F.softmax(logits, -1) + 1e-7) -
        m = jnp.max(logits, axis=-1, keepdims=True)
        e = jnp.exp(logits - m)
        s = jnp.sum(e, axis=-1, keepdims=True)
        probs = e / s + 1e-7
        psum = jnp.sum(probs, axis=-1, keepdims=True)        # Categorical normalizer

        iota = jax.lax.broadcasted_iota(jnp.int32, (B, a_dim), 1)

        def argmax_rows(vals):
            # first-occurrence argmax along the last axis, keepdims
            vmax = jnp.max(vals, axis=-1, keepdims=True)
            return jnp.min(jnp.where(vals >= vmax, iota, a_dim),
                           axis=-1, keepdims=True)

        amax = argmax_rows(probs)                            # torch argmax(probs)
        if gumbel is None:
            z = amax
        else:
            # Gumbel-max == Categorical(probs / psum).sample()
            z = argmax_rows(jnp.log(probs) + gumbel)

        # log_prob(z) of Categorical(probs) = log(probs[z]) - log(sum(probs))
        prob_z = jnp.sum(jnp.where(iota == z, probs, 0.0), axis=-1, keepdims=True)
        logp = jnp.log(prob_z) - jnp.log(psum)

        # Pack into one lane-dense slab: [logits | z | argmax | logprob | 0-pad]
        parts = [logits, z.astype(f32), amax.astype(f32), logp]
        pad = out_lanes - (a_dim + 3)
        if pad > 0:
            parts.append(jnp.zeros((B, pad), f32))
        out_ref[...] = jnp.concatenate(parts, axis=-1)

    if deterministic:
        def kernel(x_ref, w_ref, out_ref):
            body(x_ref, w_ref, out_ref, None)
    else:
        def kernel(x_ref, g_ref, w_ref, out_ref):
            body(x_ref, w_ref, out_ref, g_ref[...])
    return kernel


def pack_params(params):
    """Fold biases into weights, pack all layers into one (3, R, C) f32 slab.

    Layer i occupies packed[i, :d_in, :d_out] (weights) and
    packed[i, d_in, :d_out] (bias).  Do this once per parameter set so the
    per-call work is a single weight DMA.
    """
    w1, b1, w2, b2, w3, b3 = params
    input_dim, fc_dim = w1.shape
    a_dim = w3.shape[1]
    R = max(input_dim, fc_dim) + 1
    C = max(fc_dim, a_dim)

    def pad(w, b):
        wb = jnp.concatenate([w, jnp.reshape(b, (1, -1))], axis=0)
        return jnp.pad(wb, ((0, R - wb.shape[0]), (0, C - wb.shape[1])))

    packed = jnp.stack([pad(w1, b1), pad(w2, b2), pad(w3, b3)], axis=0)
    return packed.astype(jnp.float32), (input_dim, fc_dim, a_dim)


@functools.partial(jax.jit, static_argnames=("dims", "deterministic"))
def hc_primitive_policy(x, packed_w, key=None, *, dims, deterministic=False):
    """Pallas implementation of HC_PrimitivePolicy.forward."""
    input_dim, fc_dim, a_dim = dims
    B = x.shape[0]
    out_lanes = ((a_dim + 3 + 127) // 128) * 128     # lane-dense output slab

    kernel = _make_kernel(deterministic, input_dim, fc_dim, a_dim, out_lanes)
    vmem = pl.BlockSpec(memory_space=pltpu.MemorySpace.VMEM)
    out_shape = jax.ShapeDtypeStruct((B, out_lanes), jnp.float32)

    if deterministic:
        packed = pl.pallas_call(
            kernel, out_shape=out_shape,
            in_specs=[vmem, vmem], out_specs=vmem,
        )(x, packed_w)
    else:
        gumbel = jax.random.gumbel(key, (B, a_dim), jnp.float32)
        packed = pl.pallas_call(
            kernel, out_shape=out_shape,
            in_specs=[vmem, vmem, vmem], out_specs=vmem,
        )(x, gumbel, packed_w)

    logits = packed[:, :a_dim]
    z = packed[:, a_dim].astype(jnp.int32)           # torch returns int64 ("long")
    amax = packed[:, a_dim + 1].astype(jnp.int32)
    logp = packed[:, a_dim + 2]
    return z, {"logits": logits, "probs": amax, "logprobs": logp}


def init_params(key, input_dim, fc_dim, a_dim):
    """Deterministic torch-Linear-style init (uniform +-1/sqrt(fan_in))."""
    ks = jax.random.split(key, 6)

    def linear(kw, kb, fan_in, fan_out):
        bound = 1.0 / jnp.sqrt(fan_in)
        w = jax.random.uniform(kw, (fan_in, fan_out), jnp.float32, -bound, bound)
        b = jax.random.uniform(kb, (fan_out,), jnp.float32, -bound, bound)
        return w, b

    w1, b1 = linear(ks[0], ks[1], input_dim, fc_dim)
    w2, b2 = linear(ks[2], ks[3], fc_dim, fc_dim)
    w3, b3 = linear(ks[4], ks[5], fc_dim, a_dim)
    return (w1, b1, w2, b2, w3, b3)


if __name__ == "__main__":
    key = jax.random.PRNGKey(0)
    k_x, k_p, k_s = jax.random.split(key, 3)

    batch, input_dim, fc_dim, a_dim = 8, 32, 32, 8   # a_dim = num_options + 1
    x = jax.random.normal(k_x, (batch, input_dim), jnp.float32)
    params = init_params(k_p, input_dim, fc_dim, a_dim)
    packed_w, dims = pack_params(params)             # one-time packing

    # stochastic path (torch default: deterministic=False)
    z, out = hc_primitive_policy(x, packed_w, k_s, dims=dims, deterministic=False)
    # deterministic path (argmax); unused noise/key input dropped entirely
    z_det, out_det = hc_primitive_policy(x, packed_w, dims=dims, deterministic=True)
    jax.block_until_ready((z, out, z_det, out_det))

    # pure-JAX f32 reference for the logits (loose tol: kernel matmuls are bf16)
    w1, b1, w2, b2, w3, b3 = params
    h1 = jnp.maximum(x @ w1 + b1, 0.0)
    h2 = jnp.maximum(h1 @ w2 + b2, 0.0)
    logits_ref = h2 @ w3 + b3

    assert z.shape == (batch,)
    assert out["logits"].shape == (batch, a_dim)
    assert out["probs"].shape == (batch,)
    assert out["logprobs"].shape == (batch,)
    assert bool(jnp.all((z >= 0) & (z < a_dim)))
    assert bool(jnp.all(z_det == out_det["probs"]))          # det z == argmax(probs)
    assert bool(jnp.all(jnp.isfinite(out["logprobs"])))
    assert bool(jnp.allclose(out["logits"], logits_ref, atol=0.06, rtol=0.05))
    print("KERNEL_OK")
</pallas_src>

<mosaic_0001>
module attributes {stable_mosaic.version = 11 : i64} {
  func.func @kernel(%arg0: memref<8x32xf32, #tpu.memory_space<vmem>>, %arg1: memref<8x8xf32, #tpu.memory_space<vmem>>, %arg2: memref<3x33x32xf32, #tpu.memory_space<vmem>>, %arg3: memref<8x128xf32, #tpu.memory_space<vmem>>) attributes {dimension_semantics = [], scalar_prefetch = 0 : i64, scratch_operands = 0 : i64, tpu.core_type = #tpu.core_type<tc>} {
    %c0 = arith.constant 0 : index
    %c0_0 = arith.constant 0 : index
    %0 = vector.load %arg1[%c0, %c0_0] : memref<8x8xf32, #tpu.memory_space<vmem>>, vector<8x8xf32>
    %c0_1 = arith.constant 0 : index
    %c0_2 = arith.constant 0 : index
    %1 = vector.load %arg0[%c0_1, %c0_2] : memref<8x32xf32, #tpu.memory_space<vmem>>, vector<8x32xf32>
    %c0_3 = arith.constant 0 : index
    %c0_4 = arith.constant 0 : index
    %c0_5 = arith.constant 0 : index
    %2 = vector.load %arg2[%c0_3, %c0_4, %c0_5] : memref<3x33x32xf32, #tpu.memory_space<vmem>>, vector<1x33x32xf32>
    %3 = vector.shape_cast %2 : vector<1x33x32xf32> to vector<33x32xf32>
    %4 = vector.extract_strided_slice %3 {offsets = [0, 0], sizes = [32, 32], strides = [1, 1]} : vector<33x32xf32> to vector<32x32xf32>
    %5 = arith.truncf %4 : vector<32x32xf32> to vector<32x32xbf16>
    %6 = vector.extract_strided_slice %3 {offsets = [32, 0], sizes = [1, 32], strides = [1, 1]} : vector<33x32xf32> to vector<1x32xf32>
    %7 = arith.truncf %1 : vector<8x32xf32> to vector<8x32xbf16>
    %cst = arith.constant dense<0.000000e+00> : vector<8x32xf32>
    %8 = tpu.matmul %7, %5, %cst {dimension_numbers = #tpu.dot_dimension_numbers<[1], [0], [0], [1], [0, 0, 1, 1], [], []>} : vector<8x32xbf16>, vector<32x32xbf16>, vector<8x32xf32> -> vector<8x32xf32>
    %9 = vector.broadcast %6 : vector<1x32xf32> to vector<8x32xf32>
    %10 = arith.addf %8, %9 : vector<8x32xf32>
    %cst_6 = arith.constant 0.000000e+00 : f32
    %11 = vector.broadcast %cst_6 : f32 to vector<8x32xf32>
    %12 = arith.maximumf %10, %11 : vector<8x32xf32>
    %c1 = arith.constant 1 : index
    %c0_7 = arith.constant 0 : index
    %c0_8 = arith.constant 0 : index
    %13 = vector.load %arg2[%c1, %c0_7, %c0_8] : memref<3x33x32xf32, #tpu.memory_space<vmem>>, vector<1x33x32xf32>
    %14 = vector.shape_cast %13 : vector<1x33x32xf32> to vector<33x32xf32>
    %15 = vector.extract_strided_slice %14 {offsets = [0, 0], sizes = [32, 32], strides = [1, 1]} : vector<33x32xf32> to vector<32x32xf32>
    %16 = arith.truncf %15 : vector<32x32xf32> to vector<32x32xbf16>
    %17 = vector.extract_strided_slice %14 {offsets = [32, 0], sizes = [1, 32], strides = [1, 1]} : vector<33x32xf32> to vector<1x32xf32>
    %18 = arith.truncf %12 : vector<8x32xf32> to vector<8x32xbf16>
    %cst_9 = arith.constant dense<0.000000e+00> : vector<8x32xf32>
    %19 = tpu.matmul %18, %16, %cst_9 {dimension_numbers = #tpu.dot_dimension_numbers<[1], [0], [0], [1], [0, 0, 1, 1], [], []>} : vector<8x32xbf16>, vector<32x32xbf16>, vector<8x32xf32> -> vector<8x32xf32>
    %20 = vector.broadcast %17 : vector<1x32xf32> to vector<8x32xf32>
    %21 = arith.addf %19, %20 : vector<8x32xf32>
    %cst_10 = arith.constant 0.000000e+00 : f32
    %22 = vector.broadcast %cst_10 : f32 to vector<8x32xf32>
    %23 = arith.maximumf %21, %22 : vector<8x32xf32>
    %c2 = arith.constant 2 : index
    %c0_11 = arith.constant 0 : index
    %c0_12 = arith.constant 0 : index
    %24 = vector.load %arg2[%c2, %c0_11, %c0_12] : memref<3x33x32xf32, #tpu.memory_space<vmem>>, vector<1x33x32xf32>
    %25 = vector.shape_cast %24 : vector<1x33x32xf32> to vector<33x32xf32>
    %26 = vector.extract_strided_slice %25 {offsets = [0, 0], sizes = [32, 8], strides = [1, 1]} : vector<33x32xf32> to vector<32x8xf32>
    %27 = arith.truncf %26 : vector<32x8xf32> to vector<32x8xbf16>
    %28 = vector.extract_strided_slice %25 {offsets = [32, 0], sizes = [1, 8], strides = [1, 1]} : vector<33x32xf32> to vector<1x8xf32>
    %29 = arith.truncf %23 : vector<8x32xf32> to vector<8x32xbf16>
    %cst_13 = arith.constant dense<0.000000e+00> : vector<8x8xf32>
    %30 = tpu.matmul %29, %27, %cst_13 {dimension_numbers = #tpu.dot_dimension_numbers<[1], [0], [0], [1], [0, 0, 1, 1], [], []>} : vector<8x32xbf16>, vector<32x8xbf16>, vector<8x8xf32> -> vector<8x8xf32>
    %31 = vector.broadcast %28 : vector<1x8xf32> to vector<8x8xf32>
    %32 = arith.addf %30, %31 : vector<8x8xf32>
    %cst_14 = arith.constant dense<0xFF800000> : vector<8xf32>
    %33 = vector.multi_reduction <maximumf>, %32, %cst_14 [1] : vector<8x8xf32> to vector<8xf32>
    %34 = vector.shape_cast %33 : vector<8xf32> to vector<8x1xf32>
    %35 = vector.broadcast %34 : vector<8x1xf32> to vector<8x8xf32>
    %36 = arith.subf %32, %35 : vector<8x8xf32>
    %37 = math.exp %36 : vector<8x8xf32>
    %cst_15 = arith.constant dense<0.000000e+00> : vector<8xf32>
    %38 = vector.multi_reduction <add>, %37, %cst_15 [1] : vector<8x8xf32> to vector<8xf32>
    %39 = vector.shape_cast %38 : vector<8xf32> to vector<8x1xf32>
    %40 = vector.broadcast %39 : vector<8x1xf32> to vector<8x8xf32>
    %41 = arith.divf %37, %40 : vector<8x8xf32>
    %cst_16 = arith.constant 1.000000e-07 : f32
    %42 = vector.broadcast %cst_16 : f32 to vector<8x8xf32>
    %43 = arith.addf %41, %42 : vector<8x8xf32>
    %cst_17 = arith.constant dense<0.000000e+00> : vector<8xf32>
    %44 = vector.multi_reduction <add>, %43, %cst_17 [1] : vector<8x8xf32> to vector<8xf32>
    %45 = vector.shape_cast %44 : vector<8xf32> to vector<8x1xf32>
    %46 = tpu.iota {dimensions = array<i32: 1>} : vector<8x8xi32>
    %cst_18 = arith.constant dense<0xFF800000> : vector<8xf32>
    %47 = vector.multi_reduction <maximumf>, %43, %cst_18 [1] : vector<8x8xf32> to vector<8xf32>
    %48 = vector.shape_cast %47 : vector<8xf32> to vector<8x1xf32>
    %49 = vector.broadcast %48 : vector<8x1xf32> to vector<8x8xf32>
    %50 = arith.cmpf oge, %43, %49 : vector<8x8xf32>
    %c8_i32 = arith.constant 8 : i32
    %51 = vector.broadcast %c8_i32 : i32 to vector<8x8xi32>
    %52 = arith.select %50, %46, %51 : vector<8x8xi1>, vector<8x8xi32>
    %cst_19 = arith.constant dense<2147483647> : vector<8xi32>
    %53 = vector.multi_reduction <minsi>, %52, %cst_19 [1] : vector<8x8xi32> to vector<8xi32>
    %54 = vector.shape_cast %53 : vector<8xi32> to vector<8x1xi32>
    %55 = math.log %43 : vector<8x8xf32>
    %56 = arith.addf %55, %0 : vector<8x8xf32>
    %cst_20 = arith.constant dense<0xFF800000> : vector<8xf32>
    %57 = vector.multi_reduction <maximumf>, %56, %cst_20 [1] : vector<8x8xf32> to vector<8xf32>
    %58 = vector.shape_cast %57 : vector<8xf32> to vector<8x1xf32>
    %59 = vector.broadcast %58 : vector<8x1xf32> to vector<8x8xf32>
    %60 = arith.cmpf oge, %56, %59 : vector<8x8xf32>
    %c8_i32_21 = arith.constant 8 : i32
    %61 = vector.broadcast %c8_i32_21 : i32 to vector<8x8xi32>
    %62 = arith.select %60, %46, %61 : vector<8x8xi1>, vector<8x8xi32>
    %cst_22 = arith.constant dense<2147483647> : vector<8xi32>
    %63 = vector.multi_reduction <minsi>, %62, %cst_22 [1] : vector<8x8xi32> to vector<8xi32>
    %64 = vector.shape_cast %63 : vector<8xi32> to vector<8x1xi32>
    %65 = vector.broadcast %64 : vector<8x1xi32> to vector<8x8xi32>
    %66 = arith.cmpi eq, %46, %65 : vector<8x8xi32>
    %cst_23 = arith.constant 0.000000e+00 : f32
    %67 = vector.broadcast %cst_23 : f32 to vector<8x8xf32>
    %68 = arith.select %66, %43, %67 : vector<8x8xi1>, vector<8x8xf32>
    %cst_24 = arith.constant dense<0.000000e+00> : vector<8xf32>
    %69 = vector.multi_reduction <add>, %68, %cst_24 [1] : vector<8x8xf32> to vector<8xf32>
    %70 = vector.shape_cast %69 : vector<8xf32> to vector<8x1xf32>
    %71 = math.log %70 : vector<8x1xf32>
    %72 = math.log %45 : vector<8x1xf32>
    %73 = arith.subf %71, %72 : vector<8x1xf32>
    %74 = arith.sitofp %64 : vector<8x1xi32> to vector<8x1xf32>
    %75 = arith.sitofp %54 : vector<8x1xi32> to vector<8x1xf32>
    %cst_25 = arith.constant 0.000000e+00 : f32
    %76 = vector.broadcast %cst_25 : f32 to vector<8x117xf32>
    %77 = tpu.concatenate %32, %74, %75, %73, %76 in 1 : vector<8x8xf32>, vector<8x1xf32>, vector<8x1xf32>, vector<8x1xf32>, vector<8x117xf32> -> vector<8x128xf32>
    %c0_26 = arith.constant 0 : index
    %c0_27 = arith.constant 0 : index
    %78 = vector.load %arg3[%c0_26, %c0_27] : memref<8x128xf32, #tpu.memory_space<vmem>>, vector<8x128xf32>
    tpu.vector_store %arg3[%c0_26, %c0_27], %77 {strides = array<i32>} : memref<8x128xf32, #tpu.memory_space<vmem>>, vector<8x128xf32>,
    return
  }
}

</mosaic_0001>

<bundles_post_ra>
// kernel: hc_primitive_policy.1
= control target key start
LH: loop header
LB: loop body
LE: loop exit
PB: predicated region body
PF: predicated region fallthrough
CT: control target
= control target key end

     0   :  { %v333_v0 = vmov 0.0   ;;  %vm334_vm0 = vmmov 0   ;;  %vm29_vm1 = vcmask 261120   ;;  %vm187_vm2 = vcmask 64512   ;;  %s429_s2 = inlined_call_operand.vmem [shape: f32[3,33,32], index: 2, kind: input, shape index: {}]   ;;  %s430_s0 = inlined_call_operand.vmem [shape: f32[8,32], index: 0, kind: input, shape index: {}]   ;;  %s431_s1 = inlined_call_operand.vmem [shape: f32[8,8], index: 1, kind: input, shape index: {}]   ;;  %s432_s3 = inlined_call_operand.vmem [shape: f32[8,128], index: 3, kind: output, shape index: {}]  }
   0x1   :  { %297 = vmatprep.subr.bf16.mxu0 %v333_v0  ;;  %v17_v1 = vld [vmem:[%s429_s2] sm:$0xff]  ;;  %v18_v2 = vld [vmem:[%s429_s2 + $0x8] sm:$0xff]  ;;  %v19_v3 = vld [vmem:[%s429_s2 + $0x10] sm:$0xff]  ;;  %301 = vmatprep.mubr.msk.bf16.mxu0 %vm334_vm0, %v333_v0  ;;  %v203_v59 = vlaneseq  ;;  %vm261_vm8 = vcmask 72704   ;;  %vm263_vm9 = vcmask 80896   ;;  %vm265_vm10 = vcmask 89088  }
   0x2   :  { %v22_v4 = vpack.c.bf16 %v18_v2, %v17_v1  ;;  %v20_v5 = vld [vmem:[%s429_s2 + $0x18] sm:$0xff]  ;;  %305 = vmatprep.subr.bf16.mxu1 %v333_v0  ;;  %309 = vmatprep.mubr.msk.bf16.mxu1 %vm334_vm0, %v333_v0  ;;  %v16_v7 = vld [vmem:[%s430_s0] sm:$0xff]  ;;  %v274_v9 = vld [vmem:[%s429_s2 + $0x28] sm:$0xff] }
   0x3   :  { %v23_v6 = vpack.c.bf16 %v20_v5, %v19_v3  ;;  %v24_v8 = vpack.c.bf16 %v16_v7, %v16_v7  ;;  %v275_v10 = vld [vmem:[%s429_s2 + $0x30] sm:$0xff]  ;;  %v276_v12 = vld [vmem:[%s429_s2 + $0x38] sm:$0xff]  ;;  %v277_v13 = vld [vmem:[%s429_s2 + $0x40] sm:$0xff]  ;;  %v204_v60 = vand.u32 127, %v203_v59 }
   0x4   :  { %298 = vmatpush3.bf16.msra.mxu0 %v22_v4  ;;  %v80_v11 = vpack.c.bf16 %v275_v10, %v274_v9  ;;  %v81_v14 = vpack.c.bf16 %v277_v13, %v276_v12  ;;  %v281_v15 = vld [vmem:[%s429_s2 + $0x50] sm:$0xff]  ;;  %v282_v16 = vld [vmem:[%s429_s2 + $0x58] sm:$0xff]  ;;  %v272_v18 = vld [vmem:[%s429_s2 + $0x20] ss:$0 sm:$0xff] }
   0x5   :  { %299 = vmatprep.subr.bf16.mxu0 %v333_v0  ;;  %v137_v17 = vpack.c.bf16 %v282_v16, %v281_v15  ;;  %v283_v26 = vld [vmem:[%s429_s2 + $0x60] sm:$0xff]  ;;  %v284_v27 = vld [vmem:[%s429_s2 + $0x68] sm:$0xff]  ;;  %v286_v37 = vld [vmem:[%s429_s2 + $0x70] ss:$0 sm:$0xff] }
   0x6   :  { %306 = vmatpush3.bf16.msra.mxu1 %v80_v11  ;;  %v138_v28 = vpack.c.bf16 %v284_v27, %v283_v26  ;;  %v279_v29 = vld [vmem:[%s429_s2 + $0x48] ss:$0 sm:$0xff]  ;;  %v15_v55 = vld [vmem:[%s431_s1] sm:$0xff] }
   0x7   :  { %307 = vmatprep.subr.bf16.mxu1 %v333_v0 }
   0x8   :  { %300 = vmatpush3.bf16.msra.mxu0 %v23_v6 }
   0x9   :  { %313 = vmatprep.subr.bf16.mxu0 %v333_v0 }
   0xa   :  { %308 = vmatpush3.bf16.msra.mxu1 %v81_v14 }
   0xb   :  { %302 = vmatmul.mubr.msk.bf16.vlgmr.msra.gmra.mrb[0].mxu0 %vm29_vm1, %v24_v8 }
   0xc   :  { %317 = vmatprep.mubr.msk.bf16.mxu0 %vm334_vm0, %v333_v0  ;;  %314 = vmatpush3.bf16.msra.mxu0 %v137_v17 }
   0xd   :  { %315 = vmatprep.subr.bf16.mxu0 %v333_v0 }
  0x10   :  { %316 = vmatpush3.bf16.msra.mxu0 %v138_v28 }
  0xde   :  { %v67_v19 = vpop.f32.mrb[0].mxu0 }
  0xdf   :  { %v68_v20 = vadd.f32 %v272_v18, %v67_v19  ;;  %v303_v21 = vpop.f32.mrb[1].mxu0 }
  0xe0   :  { %v70_v22 = vpop.f32.mrb[2].mxu0 }
  0xe1   :  { %v73_v23 = vmax.f32 %v68_v20, 0.0  ;;  %v304_v24 = vpop.f32.mrb[3].mxu0 }
  0xe3   :  { %v82_v25 = vpack.c.bf16 %v73_v23, %v73_v23 }
  0xe5   :  { %310 = vmatmul.mubr.msk.bf16.vlgmr.msra.gmra.mrb[0].mxu1 %vm29_vm1, %v82_v25 }
 0x1b8   :  { %v124_v30 = vpop.f32.mrb[0].mxu1 }
 0x1b9   :  { %v125_v31 = vadd.f32 %v279_v29, %v124_v30  ;;  %v311_v32 = vpop.f32.mrb[1].mxu1 }
 0x1ba   :  { %v127_v33 = vpop.f32.mrb[2].mxu1 }
 0x1bb   :  { %v130_v34 = vmax.f32 %v125_v31, 0.0  ;;  %v312_v35 = vpop.f32.mrb[3].mxu1 }
 0x1bd   :  { %v139_v36 = vpack.c.bf16 %v130_v34, %v130_v34 }
 0x1bf   :  { %318 = vmatmul.mubr.msk.bf16.vlgmr.msra.gmra.mrb[4].mxu0 %vm29_vm1, %v139_v36 }
 0x292   :  { %v181_v38 = vpop.f32.mrb[4].mxu0 }
 0x293   :  { %v409_v39 = vadd.f32 %v286_v37, %v181_v38  ;;  %v319_v40 = vpop.f32.mrb[5].mxu0 }
 0x294   :  { %v184_v41 = vpop.f32.mrb[6].mxu0 }
 0x295   :  { %v320_v42 = vpop.f32.mrb[7].mxu0  ;;  %v188_v43 = vsel %vm187_vm2, %v409_v39, -inf }
 0x296   :  { %189 = vmax.xlane.f32.xlu0 %v188_v43 }
 0x323   :  { %v190_v44 = vpop.xlane.xlu0 %189 }
 0x324   :  { %v191_v45 = vsub.f32 %v409_v39, %v190_v44 }
 0x326   :  { %v192_v46 = vmul.f32 1.442695, %v191_v45 }
 0x328   :  { %323 = vpow2.f32 %v192_v46 }
 0x332   :  { %v324_v47 = vpop.eup %323 }
 0x333   :  { %v194_v48 = vsel %vm187_vm2, %v324_v47, 0.0 }
 0x334   :  { %195 = vadd.xlane.f32.xlu0 %v194_v48 }
 0x3c1   :  { %v196_v49 = vpop.xlane.xlu0 %195 }
 0x3c2   :  { %325 = vrcp.f32 %v196_v49 }
 0x3cc   :  { %v326_v50 = vpop.eup %325 }
 0x3cd   :  { %v198_v51 = vmul.f32 %v326_v50, %v324_v47 }
 0x3cf   :  { %v199_v52 = vadd.f32 1e-07, %v198_v51 }
 0x3d1   :  { %v205_v53 = vsel %vm187_vm2, %v199_v52, -inf  ;;  %327 = vlog2.f32 %v199_v52  ;;  %v200_v13 = vsel %vm187_vm2, %v199_v52, 0.0 }
 0x3d2   :  { %206 = vmax.xlane.f32.xlu0 %v205_v53 }
 0x3db   :  { %v328_v54 = vpop.eup %327 }
 0x3dc   :  { %v226_v56 = vmul.f32 0.6931472, %v328_v54 }
 0x3de   :  { %v227_v57 = vadd.f32 %v226_v56, %v15_v55 }
 0x3e0   :  { %v228_v58 = vsel %vm187_vm2, %v227_v57, -inf }
 0x3e1   :  { %229 = vmax.xlane.f32.xlu1 %v228_v58 }
 0x45f   :  { %v207_v61 = vpop.xlane.xlu0 %206 }
 0x460   :  { %vm208_vm3 = vcmp.ge.f32.partialorder %v199_v52, %v207_v61 }
 0x461   :  { %v209_v62 = vsel %vm208_vm3, %v204_v60, 8 }
 0x462   :  { %v210_v63 = vsel %vm187_vm2, %v209_v62, 2147483647 }
 0x463   :  { %v212_v0 = vshra.s32 %v210_v63, 16  ;;  %v211_v12 = vand.u32 65535, %v210_v63 }
 0x465   :  { %v214_v1 = vcvt.s32.f32 %v212_v0  ;;  %v213_v14 = vcvt.s32.f32 %v211_v12 }
 0x467   :  { %215 = vmin.xlane.f32.xlu0 %v214_v1 }
 0x46e   :  { %v230_v2 = vpop.xlane.xlu1 %229 }
 0x46f   :  { %vm231_vm4 = vcmp.ge.f32.partialorder %v227_v57, %v230_v2 }
 0x470   :  { %v232_v3 = vsel %vm231_vm4, %v204_v60, 8 }
 0x471   :  { %v233_v4 = vsel %vm187_vm2, %v232_v3, 2147483647 }
 0x472   :  { %v235_v5 = vshra.s32 %v233_v4, 16  ;;  %v234_v7 = vand.u32 65535, %v233_v4 }
 0x474   :  { %v237_v6 = vcvt.s32.f32 %v235_v5  ;;  %v236_v9 = vcvt.s32.f32 %v234_v7 }
 0x476   :  { %238 = vmin.xlane.f32.xlu1 %v237_v6 }
 0x4f4   :  { %v216_v11 = vpop.xlane.xlu0 %215 }
 0x4f5   :  { %vm217_vm6 = vcmp.eq.f32.partialorder %v214_v1, %v216_v11  ;;  %v222_v26 = vcvt.f32.s32 %v216_v11 }
 0x4f6   :  { %v218_v15 = vsel %vm217_vm6, %v213_v14, inf }
 0x4f7   :  { %v223_v28 = vshll.u32 %v222_v26, 16 }
 0x503   :  { %v239_v8 = vpop.xlane.xlu1 %238 }
 0x504   :  { %vm240_vm5 = vcmp.eq.f32.partialorder %v237_v6, %v239_v8  ;;  %v245_v16 = vcvt.f32.s32 %v239_v8 }
 0x505   :  { %v241_v10 = vsel %vm240_vm5, %v236_v9, inf }
 0x506   :  { %242 = vmin.xlane.f32.xlu1 %v241_v10  ;;  %v246_v18 = vshll.u32 %v245_v16, 16 }
 0x50a   :  { %201 = vadd.xlane.f32.xlu1 %v200_v13 }
 0x50e   :  { %219 = vmin.xlane.f32.xlu1 %v218_v15 }
 0x593   :  { %v243_v17 = vpop.xlane.xlu1 %242 }
 0x594   :  { %v244_v19 = vcvt.f32.s32 %v243_v17 }
 0x596   :  { %v247_v20 = vadd.s32 %v246_v18, %v244_v19 }
 0x597   :  { %v202_v23 = vpop.xlane.xlu1 %201 }
 0x598   :  { %vm248_vm7 = vcmp.eq.s32.totalorder %v204_v60, %v247_v20  ;;  %329 = vlog2.f32 %v202_v23  ;;  %v258_v31 = vcvt.s32.f32 %v247_v20 }
 0x599   :  { %v249_v21 = vsel %vm248_vm7, %v199_v52, 0.0 }
 0x59a   :  { %v250_v22 = vsel %vm187_vm2, %v249_v21, 0.0  ;;  %v260_v36 = vsel %vm187_vm2, %v409_v39, %v258_v31 }
 0x59b   :  { %251 = vadd.xlane.f32.xlu0 %v250_v22  ;;  %v220_v24 = vpop.xlane.xlu1 %219 }
 0x59c   :  { %v221_v27 = vcvt.f32.s32 %v220_v24 }
 0x59e   :  { %v224_v29 = vadd.s32 %v223_v28, %v221_v27 }
 0x5a0   :  { %v259_v33 = vcvt.s32.f32 %v224_v29 }
 0x5a2   :  { %v330_v30 = vpop.eup %329  ;;  %v262_v38 = vsel %vm261_vm8, %v260_v36, %v259_v33 }
 0x5a3   :  { %v256_v34 = vmul.f32 0.6931472, %v330_v30 }
 0x628   :  { %v252_v25 = vpop.xlane.xlu0 %251 }
 0x629   :  { %331 = vlog2.f32 %v252_v25 }
 0x633   :  { %v332_v32 = vpop.eup %331 }
 0x634   :  { %v254_v35 = vmul.f32 0.6931472, %v332_v32 }
 0x636   :  { %v257_v37 = vsub.f32 %v254_v35, %v256_v34 }
 0x638   :  { %v264_v40 = vsel %vm263_vm9, %v262_v38, %v257_v37 }
 0x639   :  { %v266_v41 = vsel %vm265_vm10, %v264_v40, 0.0 }
 0x63a   :  { %267 = vst [vmem:[%s432_s3] sm:$0xff] %v266_v41 }

</bundles_post_ra>
